<compile_context>
chip_gen: v6e
topology: v6e:2x2x1
jax: 0.10.0
libtpu: 0.0.40
codegen_flags: <defaults>
</compile_context>

<pallas_src>
import math

import jax
import jax.numpy as jnp
from jax import lax
from jax.experimental import pallas as pl
from jax.experimental.pallas import tpu as pltpu


# ---------------------------------------------------------------------------
# RoPE cache (mirrors precompute_rotary_emb in the PyTorch spec).
# ---------------------------------------------------------------------------
def precompute_rotary_emb(dim, max_positions):
    inv_freq = 1.0 / 10000 ** (
        jnp.arange(0, dim // 2, dtype=jnp.float32) * 2.0 / dim)
    positions = jnp.arange(max_positions, dtype=jnp.float32)[:, None]
    angle = positions * inv_freq[None, :]
    # (max_positions, dim//2, 2) with (cos, sin) in the last dim.
    return jnp.stack([jnp.cos(angle), jnp.sin(angle)], axis=-1)


# ---------------------------------------------------------------------------
# Pallas kernel
# ---------------------------------------------------------------------------
def _make_kernel(B, T, C, n_head, rope):
    hd = C // n_head
    half = hd // 2

    def split_heads(z):
        # (B*T, n_head*hd) -> (n_head*B, T, hd); group index g = h*B + b.
        return jnp.concatenate(
            [z[:, h * hd:(h + 1) * hd].reshape(B, T, hd) for h in range(n_head)],
            axis=0)

    def merge_heads(y):
        # (n_head*B, T, hd) -> (B*T, n_head*hd) with head-major columns,
        # matching the row order of the (C, C) output-projection weight.
        return jnp.concatenate(
            [y[h * B:(h + 1) * B].reshape(B * T, hd) for h in range(n_head)],
            axis=-1)

    def kernel(x_ref, wqkv_ref, bqkv_ref, wp_ref, bp_ref, cos_ref, sin_ref,
               o_ref):
        x2 = x_ref[...].reshape(B * T, C)

        # One fused lane-dense QKV projection (1/sqrt(hd) already folded into
        # the Q columns of wqkv / bqkv by the wrapper).
        qkv = jnp.dot(x2, wqkv_ref[...], preferred_element_type=jnp.float32)
        qkv = qkv + bqkv_ref[...]                       # (B*T, 3C)

        q = split_heads(qkv[:, 0:C])                    # (G, T, hd), G=n_head*B
        k = split_heads(qkv[:, C:2 * C])
        v = split_heads(qkv[:, 2 * C:3 * C])

        if rope:
            # q/k columns are in split-half layout (evens | odds within each
            # head, permuted in the wrapper), so RoPE is two elementwise FMAs
            # on contiguous halves.  The rotated halves are never concatenated
            # back on the lane axis: they are folded into the score
            # contraction as a sum of two half-width batched matmuls.
            cos = cos_ref[...][None]                    # (1, T, half)
            sin = sin_ref[...][None]
            q1, q2 = q[..., :half], q[..., half:]
            k1, k2 = k[..., :half], k[..., half:]
            q1r = q1 * cos - q2 * sin
            q2r = q1 * sin + q2 * cos
            k1r = k1 * cos - k2 * sin
            k2r = k1 * sin + k2 * cos
            s = (jnp.einsum("gqd,gkd->gqk", q1r, k1r,
                            preferred_element_type=jnp.float32)
                 + jnp.einsum("gqd,gkd->gqk", q2r, k2r,
                              preferred_element_type=jnp.float32))
        else:
            s = jnp.einsum("gqd,gkd->gqk", q, k,
                           preferred_element_type=jnp.float32)   # (G, T, T)

        # Causal mask == tril(block_size)[:T, :T], masked_fill with -1e10.
        rows = lax.broadcasted_iota(jnp.int32, (T, T), 0)
        cols = lax.broadcasted_iota(jnp.int32, (T, T), 1)
        s = jnp.where((cols <= rows)[None], s, jnp.float32(-1e10))

        # Softmax in f32 with deferred normalization (attn_drop is identity).
        m = jnp.max(s, axis=-1, keepdims=True)
        p = jnp.exp(s - m)
        l = jnp.sum(p, axis=-1, keepdims=True)          # (G, T, 1)

        y = jnp.einsum("gqk,gkd->gqd", p, v,
                       preferred_element_type=jnp.float32)        # (G, T, hd)
        y = y * (1.0 / l)   # exact divide for parity with the f32 reference

        # Output projection: single (B*T, C) @ (C, C) accumulating matmul over
        # the flattened head dim (no (n_head, T, C) intermediate, no head-sum).
        out = jnp.dot(merge_heads(y), wp_ref[...],
                      preferred_element_type=jnp.float32) + bp_ref[...]
        o_ref[...] = out.reshape(B, T, C).astype(o_ref.dtype)      # resid_drop = identity

    return kernel


# ---------------------------------------------------------------------------
# Wrapper
# ---------------------------------------------------------------------------
def causal_self_attention(x, params, n_head, *, rope=False, rope_cache=None):
    """params: PyTorch-style Linear weights W* (C_out, C_in), biases b* (C,)."""
    B, T, C = x.shape
    assert C % n_head == 0
    hd = C // n_head
    half = hd // 2
    scale = 1.0 / math.sqrt(hd)

    # Weight prep (free, outside the kernel): transpose to (C_in, C_out),
    # fold the 1/sqrt(hd) scale into the Q projection.
    wq = params["Wq"].T * scale
    bq = params["bq"] * scale
    wk = params["Wk"].T
    bk = params["bk"]
    wv = params["Wv"].T
    bv = params["bv"]

    if rope:
        assert hd % 2 == 0 and rope_cache is not None
        # Permute Q/K within-head output columns to split-half layout
        # (evens | odds).  Applied identically to q and k -> scores unchanged.
        perm = jnp.concatenate([jnp.arange(0, hd, 2), jnp.arange(1, hd, 2)])
        perm_full = (jnp.arange(n_head)[:, None] * hd + perm[None, :]).reshape(-1)
        wq = wq[:, perm_full]
        bq = bq[perm_full]
        wk = wk[:, perm_full]
        bk = bk[perm_full]
        cos = rope_cache[:T, :, 0]
        sin = rope_cache[:T, :, 1]
    else:
        cos = jnp.ones((T, max(half, 1)), jnp.float32)
        sin = jnp.zeros((T, max(half, 1)), jnp.float32)

    # Fuse QKV into one (C, 3C) weight / (1, 3C) bias.
    wqkv = jnp.concatenate([wq, wk, wv], axis=1)
    bqkv = jnp.concatenate([bq, bk, bv]).reshape(1, 3 * C)
    wp = params["Wp"].T                 # (C_in, C_out), rows head-major
    bp = params["bp"].reshape(1, C)

    kernel = _make_kernel(B, T, C, n_head, rope)

    def full(shape):
        return pl.BlockSpec(shape, lambda i, _s=shape: (0,) * len(_s))

    return pl.pallas_call(
        kernel,
        out_shape=jax.ShapeDtypeStruct((B, T, C), x.dtype),
        grid=(1,),                      # whole batch per invocation
        in_specs=[
            full((B, T, C)),
            full((C, 3 * C)),
            full((1, 3 * C)),
            full((C, C)),
            full((1, C)),
            full((T, cos.shape[1])),
            full((T, sin.shape[1])),
        ],
        out_specs=full((B, T, C)),
        compiler_params=pltpu.CompilerParams(
            dimension_semantics=("arbitrary",)),
    )(x, wqkv, bqkv, wp, bp, cos, sin)


# ---------------------------------------------------------------------------
# Pure-JAX reference (mirrors the PyTorch forward, eval mode).
# ---------------------------------------------------------------------------
def _apply_rotary_emb_ref(x, rope_cache):
    # x: (B, h, T, hd); rope_cache: (max_pos, hd//2, 2)
    T = x.shape[2]
    rc = rope_cache[:T]
    xr = x[..., 0::2]
    xi = x[..., 1::2]
    cos = rc[..., 0]
    sin = rc[..., 1]
    out_r = xr * cos - xi * sin
    out_i = xr * sin + xi * cos
    return jnp.stack([out_r, out_i], axis=-1).reshape(x.shape)


def reference(x, params, n_head, *, rope=False, rope_cache=None):
    B, T, C = x.shape
    hd = C // n_head

    def lin(z, W, b):
        return jnp.einsum("btc,oc->bto", z, W) + b

    k = lin(x, params["Wk"], params["bk"]).reshape(B, T, n_head, hd).transpose(0, 2, 1, 3)
    q = lin(x, params["Wq"], params["bq"]).reshape(B, T, n_head, hd).transpose(0, 2, 1, 3)
    v = lin(x, params["Wv"], params["bv"]).reshape(B, T, n_head, hd).transpose(0, 2, 1, 3)
    if rope:
        q = _apply_rotary_emb_ref(q, rope_cache)
        k = _apply_rotary_emb_ref(k, rope_cache)
    att = (q @ jnp.swapaxes(k, -2, -1)) * (1.0 / math.sqrt(hd))
    mask = jnp.tril(jnp.ones((T, T)))
    att = jnp.where(mask == 0, -1e10, att)
    att = jax.nn.softmax(att, axis=-1)
    y = att @ v
    y = y.transpose(0, 2, 1, 3).reshape(B, T, C)
    y = jnp.einsum("btc,oc->bto", y, params["Wp"]) + params["bp"]
    return y


if __name__ == "__main__":
    # Config: n_embd=32, n_head=4, block_size=8, rope=True, eval mode.
    n_embd, n_head, block_size = 32, 4, 8
    B, T = 2, 8

    key = jax.random.PRNGKey(0)
    keys = jax.random.split(key, 10)

    x = jax.random.normal(keys[0], (B, T, n_embd), jnp.float32)

    bound = 1.0 / math.sqrt(n_embd)
    params = {
        "Wq": jax.random.uniform(keys[1], (n_embd, n_embd), jnp.float32, -bound, bound),
        "bq": jax.random.uniform(keys[2], (n_embd,), jnp.float32, -bound, bound),
        "Wk": jax.random.uniform(keys[3], (n_embd, n_embd), jnp.float32, -bound, bound),
        "bk": jax.random.uniform(keys[4], (n_embd,), jnp.float32, -bound, bound),
        "Wv": jax.random.uniform(keys[5], (n_embd, n_embd), jnp.float32, -bound, bound),
        "bv": jax.random.uniform(keys[6], (n_embd,), jnp.float32, -bound, bound),
        "Wp": jax.random.uniform(keys[7], (n_embd, n_embd), jnp.float32, -bound, bound),
        "bp": jax.random.uniform(keys[8], (n_embd,), jnp.float32, -bound, bound),
    }

    rope_cache = precompute_rotary_emb(n_embd // n_head, block_size)

    out = causal_self_attention(x, params, n_head, rope=True, rope_cache=rope_cache)
    out = jax.block_until_ready(out)

    ref = reference(x, params, n_head, rope=True, rope_cache=rope_cache)
    err = float(jnp.max(jnp.abs(out - ref)))
    assert out.shape == (B, T, n_embd)
    assert jnp.allclose(out, ref, atol=1e-4, rtol=1e-4), f"max abs err {err}"

    print("KERNEL_OK")
</pallas_src>

<mosaic_0001>
module attributes {stable_mosaic.version = 11 : i64} {
  func.func @kernel(%arg0: i32, %arg1: memref<2x8x32xf32, #tpu.memory_space<vmem>>, %arg2: memref<32x96xf32, #tpu.memory_space<vmem>>, %arg3: memref<1x96xf32, #tpu.memory_space<vmem>>, %arg4: memref<32x32xf32, #tpu.memory_space<vmem>>, %arg5: memref<1x32xf32, #tpu.memory_space<vmem>>, %arg6: memref<8x4xf32, #tpu.memory_space<vmem>>, %arg7: memref<8x4xf32, #tpu.memory_space<vmem>>, %arg8: memref<2x8x32xf32, #tpu.memory_space<vmem>>) attributes {dimension_semantics = [#tpu.dimension_semantics<arbitrary>], iteration_bounds = array<i64: 1>, scalar_prefetch = 0 : i64, scratch_operands = 0 : i64, tpu.core_type = #tpu.core_type<tc>, window_params = [{pipeline_mode = #tpu.pipeline_mode<synchronous>, transform_indices = @transform_0, window_bounds = array<i64: 2, 8, 32>}, {pipeline_mode = #tpu.pipeline_mode<synchronous>, transform_indices = @transform_1, window_bounds = array<i64: 32, 96>}, {pipeline_mode = #tpu.pipeline_mode<synchronous>, transform_indices = @transform_2, window_bounds = array<i64: 1, 96>}, {pipeline_mode = #tpu.pipeline_mode<synchronous>, transform_indices = @transform_3, window_bounds = array<i64: 32, 32>}, {pipeline_mode = #tpu.pipeline_mode<synchronous>, transform_indices = @transform_4, window_bounds = array<i64: 1, 32>}, {pipeline_mode = #tpu.pipeline_mode<synchronous>, transform_indices = @transform_5, window_bounds = array<i64: 8, 4>}, {pipeline_mode = #tpu.pipeline_mode<synchronous>, transform_indices = @transform_6, window_bounds = array<i64: 8, 4>}, {pipeline_mode = #tpu.pipeline_mode<synchronous>, transform_indices = @transform_7, window_bounds = array<i64: 2, 8, 32>}]} {
    %c0 = arith.constant 0 : index
    %c0_0 = arith.constant 0 : index
    %c0_1 = arith.constant 0 : index
    %0 = vector.load %arg1[%c0, %c0_0, %c0_1] : memref<2x8x32xf32, #tpu.memory_space<vmem>>, vector<2x8x32xf32>
    %1 = vector.shape_cast %0 : vector<2x8x32xf32> to vector<16x32xf32>
    %c0_2 = arith.constant 0 : index
    %c0_3 = arith.constant 0 : index
    %2 = vector.load %arg2[%c0_2, %c0_3] : memref<32x96xf32, #tpu.memory_space<vmem>>, vector<32x96xf32>
    %cst = arith.constant dense<0.000000e+00> : vector<16x96xf32>
    %3 = tpu.matmul %1, %2, %cst {dimension_numbers = #tpu.dot_dimension_numbers<[1], [0], [0], [1], [0, 0, 1, 1], [], []>} : vector<16x32xf32>, vector<32x96xf32>, vector<16x96xf32> -> vector<16x96xf32>
    %c0_4 = arith.constant 0 : index
    %c0_5 = arith.constant 0 : index
    %4 = vector.load %arg3[%c0_4, %c0_5] : memref<1x96xf32, #tpu.memory_space<vmem>>, vector<1x96xf32>
    %5 = vector.broadcast %4 : vector<1x96xf32> to vector<16x96xf32>
    %6 = arith.addf %3, %5 : vector<16x96xf32>
    %7 = vector.extract_strided_slice %6 {offsets = [0, 0], sizes = [16, 32], strides = [1, 1]} : vector<16x96xf32> to vector<16x32xf32>
    %8 = vector.extract_strided_slice %7 {offsets = [0, 0], sizes = [16, 8], strides = [1, 1]} : vector<16x32xf32> to vector<16x8xf32>
    %9 = vector.shape_cast %8 : vector<16x8xf32> to vector<2x8x8xf32>
    %10 = vector.extract_strided_slice %7 {offsets = [0, 8], sizes = [16, 8], strides = [1, 1]} : vector<16x32xf32> to vector<16x8xf32>
    %11 = vector.shape_cast %10 : vector<16x8xf32> to vector<2x8x8xf32>
    %12 = vector.extract_strided_slice %7 {offsets = [0, 16], sizes = [16, 8], strides = [1, 1]} : vector<16x32xf32> to vector<16x8xf32>
    %13 = vector.shape_cast %12 : vector<16x8xf32> to vector<2x8x8xf32>
    %14 = vector.extract_strided_slice %7 {offsets = [0, 24], sizes = [16, 8], strides = [1, 1]} : vector<16x32xf32> to vector<16x8xf32>
    %15 = vector.shape_cast %14 : vector<16x8xf32> to vector<2x8x8xf32>
    %16 = tpu.concatenate %9, %11, %13, %15 in 0 : vector<2x8x8xf32>, vector<2x8x8xf32>, vector<2x8x8xf32>, vector<2x8x8xf32> -> vector<8x8x8xf32>
    %17 = vector.extract_strided_slice %6 {offsets = [0, 32], sizes = [16, 32], strides = [1, 1]} : vector<16x96xf32> to vector<16x32xf32>
    %18 = vector.extract_strided_slice %17 {offsets = [0, 0], sizes = [16, 8], strides = [1, 1]} : vector<16x32xf32> to vector<16x8xf32>
    %19 = vector.shape_cast %18 : vector<16x8xf32> to vector<2x8x8xf32>
    %20 = vector.extract_strided_slice %17 {offsets = [0, 8], sizes = [16, 8], strides = [1, 1]} : vector<16x32xf32> to vector<16x8xf32>
    %21 = vector.shape_cast %20 : vector<16x8xf32> to vector<2x8x8xf32>
    %22 = vector.extract_strided_slice %17 {offsets = [0, 16], sizes = [16, 8], strides = [1, 1]} : vector<16x32xf32> to vector<16x8xf32>
    %23 = vector.shape_cast %22 : vector<16x8xf32> to vector<2x8x8xf32>
    %24 = vector.extract_strided_slice %17 {offsets = [0, 24], sizes = [16, 8], strides = [1, 1]} : vector<16x32xf32> to vector<16x8xf32>
    %25 = vector.shape_cast %24 : vector<16x8xf32> to vector<2x8x8xf32>
    %26 = tpu.concatenate %19, %21, %23, %25 in 0 : vector<2x8x8xf32>, vector<2x8x8xf32>, vector<2x8x8xf32>, vector<2x8x8xf32> -> vector<8x8x8xf32>
    %27 = vector.extract_strided_slice %6 {offsets = [0, 64], sizes = [16, 32], strides = [1, 1]} : vector<16x96xf32> to vector<16x32xf32>
    %28 = vector.extract_strided_slice %27 {offsets = [0, 0], sizes = [16, 8], strides = [1, 1]} : vector<16x32xf32> to vector<16x8xf32>
    %29 = vector.shape_cast %28 : vector<16x8xf32> to vector<2x8x8xf32>
    %30 = vector.extract_strided_slice %27 {offsets = [0, 8], sizes = [16, 8], strides = [1, 1]} : vector<16x32xf32> to vector<16x8xf32>
    %31 = vector.shape_cast %30 : vector<16x8xf32> to vector<2x8x8xf32>
    %32 = vector.extract_strided_slice %27 {offsets = [0, 16], sizes = [16, 8], strides = [1, 1]} : vector<16x32xf32> to vector<16x8xf32>
    %33 = vector.shape_cast %32 : vector<16x8xf32> to vector<2x8x8xf32>
    %34 = vector.extract_strided_slice %27 {offsets = [0, 24], sizes = [16, 8], strides = [1, 1]} : vector<16x32xf32> to vector<16x8xf32>
    %35 = vector.shape_cast %34 : vector<16x8xf32> to vector<2x8x8xf32>
    %36 = tpu.concatenate %29, %31, %33, %35 in 0 : vector<2x8x8xf32>, vector<2x8x8xf32>, vector<2x8x8xf32>, vector<2x8x8xf32> -> vector<8x8x8xf32>
    %c0_6 = arith.constant 0 : index
    %c0_7 = arith.constant 0 : index
    %37 = vector.load %arg6[%c0_6, %c0_7] : memref<8x4xf32, #tpu.memory_space<vmem>>, vector<8x4xf32>
    %38 = vector.shape_cast %37 : vector<8x4xf32> to vector<1x8x4xf32>
    %c0_8 = arith.constant 0 : index
    %c0_9 = arith.constant 0 : index
    %39 = vector.load %arg7[%c0_8, %c0_9] : memref<8x4xf32, #tpu.memory_space<vmem>>, vector<8x4xf32>
    %40 = vector.shape_cast %39 : vector<8x4xf32> to vector<1x8x4xf32>
    %41 = vector.extract_strided_slice %16 {offsets = [0, 0, 0], sizes = [8, 8, 4], strides = [1, 1, 1]} : vector<8x8x8xf32> to vector<8x8x4xf32>
    %42 = vector.extract_strided_slice %16 {offsets = [0, 0, 4], sizes = [8, 8, 4], strides = [1, 1, 1]} : vector<8x8x8xf32> to vector<8x8x4xf32>
    %43 = vector.extract_strided_slice %26 {offsets = [0, 0, 0], sizes = [8, 8, 4], strides = [1, 1, 1]} : vector<8x8x8xf32> to vector<8x8x4xf32>
    %44 = vector.extract_strided_slice %26 {offsets = [0, 0, 4], sizes = [8, 8, 4], strides = [1, 1, 1]} : vector<8x8x8xf32> to vector<8x8x4xf32>
    %45 = vector.broadcast %38 : vector<1x8x4xf32> to vector<8x8x4xf32>
    %46 = arith.mulf %41, %45 : vector<8x8x4xf32>
    %47 = vector.broadcast %40 : vector<1x8x4xf32> to vector<8x8x4xf32>
    %48 = arith.mulf %42, %47 : vector<8x8x4xf32>
    %49 = arith.subf %46, %48 : vector<8x8x4xf32>
    %50 = vector.broadcast %40 : vector<1x8x4xf32> to vector<8x8x4xf32>
    %51 = arith.mulf %41, %50 : vector<8x8x4xf32>
    %52 = vector.broadcast %38 : vector<1x8x4xf32> to vector<8x8x4xf32>
    %53 = arith.mulf %42, %52 : vector<8x8x4xf32>
    %54 = arith.addf %51, %53 : vector<8x8x4xf32>
    %55 = vector.broadcast %38 : vector<1x8x4xf32> to vector<8x8x4xf32>
    %56 = arith.mulf %43, %55 : vector<8x8x4xf32>
    %57 = vector.broadcast %40 : vector<1x8x4xf32> to vector<8x8x4xf32>
    %58 = arith.mulf %44, %57 : vector<8x8x4xf32>
    %59 = arith.subf %56, %58 : vector<8x8x4xf32>
    %60 = vector.broadcast %40 : vector<1x8x4xf32> to vector<8x8x4xf32>
    %61 = arith.mulf %43, %60 : vector<8x8x4xf32>
    %62 = vector.broadcast %38 : vector<1x8x4xf32> to vector<8x8x4xf32>
    %63 = arith.mulf %44, %62 : vector<8x8x4xf32>
    %64 = arith.addf %61, %63 : vector<8x8x4xf32>
    "tpu.trace_start"() <{level = 10 : i32, message = "gqd,gkd->gqk"}> : () -> ()
    %cst_10 = arith.constant dense<0.000000e+00> : vector<8x8x8xf32>
    %65 = tpu.matmul %49, %59, %cst_10 {dimension_numbers = #tpu.dot_dimension_numbers<[2], [2], [1], [1], [0, 0, 0, 1, 1, 1], [0], [0]>} : vector<8x8x4xf32>, vector<8x8x4xf32>, vector<8x8x8xf32> -> vector<8x8x8xf32>
    %cst_11 = arith.constant dense<0.000000e+00> : vector<8x8x8xf32>
    %66 = tpu.matmul %54, %64, %cst_11 {dimension_numbers = #tpu.dot_dimension_numbers<[2], [2], [1], [1], [0, 0, 0, 1, 1, 1], [0], [0]>} : vector<8x8x4xf32>, vector<8x8x4xf32>, vector<8x8x8xf32> -> vector<8x8x8xf32>
    "tpu.trace_stop"() : () -> ()
    %67 = arith.addf %65, %66 : vector<8x8x8xf32>
    %68 = tpu.iota {dimensions = array<i32: 0>} : vector<8x8xi32>
    %69 = tpu.iota {dimensions = array<i32: 1>} : vector<8x8xi32>
    %70 = arith.cmpi sle, %69, %68 : vector<8x8xi32>
    %71 = vector.shape_cast %70 : vector<8x8xi1> to vector<1x8x8xi1>
    %cst_12 = arith.constant -1.000000e+10 : f32
    %72 = vector.shape_cast %71 : vector<1x8x8xi1> to vector<1x8x8xi1>
    %73 = vector.broadcast %72 : vector<1x8x8xi1> to vector<8x8x8xi1>
    %74 = vector.broadcast %cst_12 : f32 to vector<8x8x8xf32>
    %75 = arith.select %73, %67, %74 : vector<8x8x8xi1>, vector<8x8x8xf32>
    %cst_13 = arith.constant dense<0xFF800000> : vector<8x8xf32>
    %76 = vector.multi_reduction <maximumf>, %75, %cst_13 [2] : vector<8x8x8xf32> to vector<8x8xf32>
    %77 = vector.shape_cast %76 : vector<8x8xf32> to vector<8x8x1xf32>
    %78 = vector.broadcast %77 : vector<8x8x1xf32> to vector<8x8x8xf32>
    %79 = arith.subf %75, %78 : vector<8x8x8xf32>
    %80 = math.exp %79 : vector<8x8x8xf32>
    %cst_14 = arith.constant dense<0.000000e+00> : vector<8x8xf32>
    %81 = vector.multi_reduction <add>, %80, %cst_14 [2] : vector<8x8x8xf32> to vector<8x8xf32>
    %82 = vector.shape_cast %81 : vector<8x8xf32> to vector<8x8x1xf32>
    "tpu.trace_start"() <{level = 10 : i32, message = "gqk,gkd->gqd"}> : () -> ()
    %cst_15 = arith.constant dense<0.000000e+00> : vector<8x8x8xf32>
    %83 = tpu.matmul %80, %36, %cst_15 {dimension_numbers = #tpu.dot_dimension_numbers<[2], [1], [1], [2], [0, 0, 0, 1, 1, 2], [0], [0]>} : vector<8x8x8xf32>, vector<8x8x8xf32>, vector<8x8x8xf32> -> vector<8x8x8xf32>
    "tpu.trace_stop"() : () -> ()
    %cst_16 = arith.constant 1.000000e+00 : f32
    %84 = vector.broadcast %cst_16 : f32 to vector<8x8x1xf32>
    %85 = arith.divf %84, %82 : vector<8x8x1xf32>
    %86 = vector.broadcast %85 : vector<8x8x1xf32> to vector<8x8x8xf32>
    %87 = arith.mulf %83, %86 : vector<8x8x8xf32>
    %88 = vector.extract_strided_slice %87 {offsets = [0, 0, 0], sizes = [2, 8, 8], strides = [1, 1, 1]} : vector<8x8x8xf32> to vector<2x8x8xf32>
    %89 = vector.shape_cast %88 : vector<2x8x8xf32> to vector<16x8xf32>
    %90 = vector.extract_strided_slice %87 {offsets = [2, 0, 0], sizes = [2, 8, 8], strides = [1, 1, 1]} : vector<8x8x8xf32> to vector<2x8x8xf32>
    %91 = vector.shape_cast %90 : vector<2x8x8xf32> to vector<16x8xf32>
    %92 = vector.extract_strided_slice %87 {offsets = [4, 0, 0], sizes = [2, 8, 8], strides = [1, 1, 1]} : vector<8x8x8xf32> to vector<2x8x8xf32>
    %93 = vector.shape_cast %92 : vector<2x8x8xf32> to vector<16x8xf32>
    %94 = vector.extract_strided_slice %87 {offsets = [6, 0, 0], sizes = [2, 8, 8], strides = [1, 1, 1]} : vector<8x8x8xf32> to vector<2x8x8xf32>
    %95 = vector.shape_cast %94 : vector<2x8x8xf32> to vector<16x8xf32>
    %96 = tpu.concatenate %89, %91, %93, %95 in 1 : vector<16x8xf32>, vector<16x8xf32>, vector<16x8xf32>, vector<16x8xf32> -> vector<16x32xf32>
    %c0_17 = arith.constant 0 : index
    %c0_18 = arith.constant 0 : index
    %97 = vector.load %arg4[%c0_17, %c0_18] : memref<32x32xf32, #tpu.memory_space<vmem>>, vector<32x32xf32>
    %cst_19 = arith.constant dense<0.000000e+00> : vector<16x32xf32>
    %98 = tpu.matmul %96, %97, %cst_19 {dimension_numbers = #tpu.dot_dimension_numbers<[1], [0], [0], [1], [0, 0, 1, 1], [], []>} : vector<16x32xf32>, vector<32x32xf32>, vector<16x32xf32> -> vector<16x32xf32>
    %c0_20 = arith.constant 0 : index
    %c0_21 = arith.constant 0 : index
    %99 = vector.load %arg5[%c0_20, %c0_21] : memref<1x32xf32, #tpu.memory_space<vmem>>, vector<1x32xf32>
    %100 = vector.broadcast %99 : vector<1x32xf32> to vector<16x32xf32>
    %101 = arith.addf %98, %100 : vector<16x32xf32>
    %102 = vector.shape_cast %101 : vector<16x32xf32> to vector<2x8x32xf32>
    %c0_22 = arith.constant 0 : index
    %c0_23 = arith.constant 0 : index
    %c0_24 = arith.constant 0 : index
    %103 = vector.load %arg8[%c0_22, %c0_23, %c0_24] : memref<2x8x32xf32, #tpu.memory_space<vmem>>, vector<2x8x32xf32>
    tpu.vector_store %arg8[%c0_22, %c0_23, %c0_24], %102 {strides = array<i32>} : memref<2x8x32xf32, #tpu.memory_space<vmem>>, vector<2x8x32xf32>,
    return
  }
  func.func @transform_0(%arg0: i32) -> (i32, i32, i32) {
    %c0_i32 = arith.constant 0 : i32
    %c0_i32_0 = arith.constant 0 : i32
    %c0_i32_1 = arith.constant 0 : i32
    %c0_i32_2 = arith.constant 0 : i32
    return %c0_i32, %c0_i32_0, %c0_i32_1 : i32, i32, i32
  }
  func.func @transform_1(%arg0: i32) -> (i32, i32) {
    %c0_i32 = arith.constant 0 : i32
    %c0_i32_0 = arith.constant 0 : i32
    %c0_i32_1 = arith.constant 0 : i32
    return %c0_i32, %c0_i32_0 : i32, i32
  }
  func.func @transform_2(%arg0: i32) -> (i32, i32) {
    %c0_i32 = arith.constant 0 : i32
    %c0_i32_0 = arith.constant 0 : i32
    %c0_i32_1 = arith.constant 0 : i32
    return %c0_i32, %c0_i32_0 : i32, i32
  }
  func.func @transform_3(%arg0: i32) -> (i32, i32) {
    %c0_i32 = arith.constant 0 : i32
    %c0_i32_0 = arith.constant 0 : i32
    %c0_i32_1 = arith.constant 0 : i32
    return %c0_i32, %c0_i32_0 : i32, i32
  }
  func.func @transform_4(%arg0: i32) -> (i32, i32) {
    %c0_i32 = arith.constant 0 : i32
    %c0_i32_0 = arith.constant 0 : i32
    %c0_i32_1 = arith.constant 0 : i32
    return %c0_i32, %c0_i32_0 : i32, i32
  }
  func.func @transform_5(%arg0: i32) -> (i32, i32) {
    %c0_i32 = arith.constant 0 : i32
    %c0_i32_0 = arith.constant 0 : i32
    %c0_i32_1 = arith.constant 0 : i32
    return %c0_i32, %c0_i32_0 : i32, i32
  }
  func.func @transform_6(%arg0: i32) -> (i32, i32) {
    %c0_i32 = arith.constant 0 : i32
    %c0_i32_0 = arith.constant 0 : i32
    %c0_i32_1 = arith.constant 0 : i32
    return %c0_i32, %c0_i32_0 : i32, i32
  }
  func.func @transform_7(%arg0: i32) -> (i32, i32, i32) {
    %c0_i32 = arith.constant 0 : i32
    %c0_i32_0 = arith.constant 0 : i32
    %c0_i32_1 = arith.constant 0 : i32
    %c0_i32_2 = arith.constant 0 : i32
    return %c0_i32, %c0_i32_0, %c0_i32_1 : i32, i32, i32
  }
}

</mosaic_0001>

<bundles_post_ra>
// kernel: tpu_custom_call.1
= control target key start
LH: loop header
LB: loop body
LE: loop exit
PB: predicated region body
PF: predicated region fallthrough
CT: control target
= control target key end

     0   :  { %12 = vsyncpa [#allocation3], 0  ;;  %s3374_s0 = inlined_call_operand.vmem [shape: f32[2,8,32], index: 0, kind: input, shape index: {}]   ;;  %s3375_s1 = inlined_call_operand.hbm [shape: f32[32,96], index: 1, kind: input, shape index: {}]   ;;  %s3376_s2 = inlined_call_operand.vmem [shape: f32[1,96], index: 2, kind: input, shape index: {}]   ;;  %s3377_s3 = inlined_call_operand.hbm [shape: f32[32,32], index: 3, kind: input, shape index: {}]   ;;  %s3378_s4 = inlined_call_operand.vmem [shape: f32[1,32], index: 4, kind: input, shape index: {}]   ;;  %s3379_s5 = inlined_call_operand.vmem [shape: f32[8,4], index: 5, kind: input, shape index: {}]   ;;  %s3380_s6 = inlined_call_operand.vmem [shape: f32[8,4], index: 6, kind: input, shape index: {}]   ;;  %s3381_s7 = inlined_call_operand.hbm [shape: f32[2,8,32], index: 7, kind: output, shape index: {}]  }
   0x1   :  { %13 = vsyncpa [#allocation6], 0 }
   0x2   :  { %14 = vsyncpa [#allocation4], 0  ;;  %s2893_s24 = smov [#allocation2]  }
   0x3   :  { %s22_s25 = sshll.u32 %s2893_s24, 4  ;;  %s23_s25 = int_to_ptr.vmem [resolvable:$true] %s22_s25 }
   0x4   :  { %s2835_s26 = scalar_lea.vmem %s23_s25, 512  ;;  %p2840_p1 = scmp.lt.s32.totalorder %s23_s25, %s23_s25 }
   0x5   :  { %p2836_p0 = scmp.ne.s32.totalorder %s23_s25, %s2835_s26  ;;  %p2841_p2 = scmp.lt.s32.totalorder %s2835_s26, %s2835_s26 }
   0x7   :  { %p2842_p3 = por %p2841_p2, %p2840_p1 }
   0x9   :  { %p2843_p4 = pnand %p2842_p3, %p2836_p0 }
   0xb   :  { %2846 = shalt.err (!%p2843_p4)
}
   0xc   :  { %s2894_s27 = smov 128   ;;  %s2895_s28 = smov 8  }
   0xd   :  { %28 = dma.hbm_to_vmem [thread:$0]  %s3375_s1, 512, %s23_s25, [#allocation3], %s2894_s27, %s2894_s27, %s2895_s28  }
   0xe   :  { %s2896_s8 = smov [#allocation5]  }
   0xf   :  { %s36_s9 = sshll.u32 %s2896_s8, 4  ;;  %s37_s9 = int_to_ptr.vmem [resolvable:$true] %s36_s9 }
  0x10   :  { %s2855_s10 = scalar_lea.vmem %s37_s9, 512  ;;  %p2860_p6 = scmp.lt.s32.totalorder %s37_s9, %s37_s9 }
  0x11   :  { %p2856_p5 = scmp.ne.s32.totalorder %s37_s9, %s2855_s10  ;;  %p2861_p7 = scmp.lt.s32.totalorder %s2855_s10, %s2855_s10 }
  0x13   :  { %p2862_p8 = por %p2861_p7, %p2860_p6 }
  0x15   :  { %p2863_p9 = pnand %p2862_p8, %p2856_p5 }
  0x17   :  { %2866 = shalt.err (!%p2863_p9)
}
  0x18   :  { %42 = dma.hbm_to_vmem [thread:$0]  %s3377_s3, 512, %s37_s9, [#allocation6], %s2894_s27, %s2894_s27, %s2895_s28  }
  0x19   :  { %2887 = dma.done.wait [#allocation3], 512  }
  0x1a   :  { %2888 = vsyncadd [#allocation3], 4294966784 }
  0x1b   :  { %2889 = dma.done.wait [#allocation6], 512  }
  0x1c   :  { %2890 = vsyncadd [#allocation6], 4294966784  ;;  %vm68_vm0 = vcmask 261120   ;;  %v60_v0 = vld [vmem:[#allocation2 + $0x18] sm:$0xff]  ;;  %v59_v1 = vld [vmem:[#allocation2 + $0x10] sm:$0xff]  ;;  %s2897_s3 = smov 36  }
  0x1d   :  { %2635 = vmatprep.subr.mxu0 %v60_v0  ;;  %v55_v2 = vld [vmem:[%s3374_s0] sm:$0xff]  ;;  %v58_v3 = vld [vmem:[#allocation2 + $0x8] sm:$0xff]  ;;  %s2900_s20 = smov 104   ;;  %s2901_s22 = smov 32   ;;  %v2905_v60 = vmov 0.0   ;;  %vm2906_vm1 = vmmov 0  }
  0x1e   :  { %2636 = vmatpush3.msra.mxu0 %v60_v0  ;;  %2643 = vmatprep.mubr.msk.f32.mxu0 %vm68_vm0, %v55_v2  ;;  %v2970_v4 = vld [vmem:[%s3379_s5] sm:$0xff]  ;;  %v56_v6 = vld [vmem:[%s3374_s0 + $0x8] sm:$0xff]  ;;  %s2898_s5 = smov 120   ;;  %s2899_s0 = smov 112   ;;  %vm419_vm2 = vcmask 31744   ;;  %vm1680_vm4 = vcmask 64512  }
  0x1f   :  { %2637 = vmatprep.subr.mxu0 %v59_v1  ;;  %365 = vrot.lane.b32.xlu0 %v2970_v4, %s2897_s3  ;;  %v57_v5 = vld [vmem:[#allocation2] sm:$0xff]  ;;  %s2902_s23 = smov 124   ;;  %s2903_s24 = smov 4   ;;  %vm2411_vm5 = vcmask 130048   ;;  %vm2414_vm6 = vcmask 195584  }
  0x20   :  { %2638 = vmatpush3.msra.mxu0 %v59_v1  ;;  %v2529_v7 = vld [vmem:[%s3376_s2] ss:$0 sm:$0xff]  ;;  %2646 = vmatprep.subr.mxu1 %v2905_v60  ;;  %s2907_s25 = smov 64   ;;  %s2908_s26 = smov 16  }
  0x21   :  { %2639 = vmatprep.subr.mxu0 %v58_v3  ;;  %v2993_v12 = vld [vmem:[%s3380_s6] sm:$0xff]  ;;  %s2904_s6 = smov 96   ;;  %2648 = vmatprep.mubr.msk.f32.mxu1 %vm2906_vm1, %v2905_v60  ;;  %s2909_s29 = smov 24  }
  0x22   :  { %2640 = vmatpush3.msra.mxu0 %v58_v3  ;;  %s2910_s9 = smov [#allocation7]  }
  0x23   :  { %2641 = vmatprep.subr.mxu0 %v57_v5  ;;  %s2516_s10 = sshll.u32 %s2910_s9, 4  ;;  %s2517_s10 = int_to_ptr.vmem [resolvable:$true] %s2516_s10 }
  0x24   :  { %2642 = vmatpush3.msra.mxu0 %v57_v5  ;;  %s2867_s11 = scalar_lea.vmem %s2517_s10, 256  ;;  %p2872_p11 = scmp.lt.s32.totalorder %s2517_s10, %s2517_s10 }
  0x25   :  { %2644 = vmatmul.mubr.msk.f32.vlgmr.msra.gmra.mxu0 %vm68_vm0, %v56_v6  ;;  %2666 = vmatprep.subr.mxu0 %v2905_v60  ;;  %p2868_p10 = scmp.ne.s32.totalorder %s2517_s10, %s2867_s11  ;;  %p2873_p12 = scmp.lt.s32.totalorder %s2867_s11, %s2867_s11 }
  0x26   :  { %2668 = vmatprep.mubr.msk.f32.mxu0 %vm2906_vm1, %v2905_v60 }
  0x27   :  { %p2874_p13 = por %p2873_p12, %p2872_p11 }
  0x29   :  { %p2875_p0 = pnand %p2874_p13, %p2868_p10 }
  0x91   :  { %v366_v13 = vpop.permute.xlu0 %365 }
  0xe5   :  { %v2645_v8 = vpop.f32.mrf.mxu0 }
  0xe6   :  { %v2980_v9 = vadd.f32 %v2645_v8, %v2529_v7 }
  0xe7   :  { %v141_v10 = vpop.f32.mrf.mxu0 }
  0xe8   :  { %v2982_v11 = vadd.f32 %v2529_v7, %v141_v10  ;;  %154 = vrot.lane.b32.xlu1 %v2980_v9, %s2898_s5  ;;  %v369_v15 = vmul.f32 %v366_v13, %v2980_v9 }
  0xea   :  { %152 = vrot.lane.b32.xlu0 %v2982_v11, %s2898_s5  ;;  %v368_v14 = vmul.f32 %v366_v13, %v2982_v11 }
  0xec   :  { %158 = vrot.lane.b32.xlu1 %v2982_v11, %s2899_s0 }
  0xee   :  { %160 = vrot.lane.b32.xlu0 %v2980_v9, %s2899_s0 }
  0xf0   :  { %164 = vrot.lane.b32.xlu1 %v2982_v11, %s2900_s20 }
  0xf2   :  { %166 = vrot.lane.b32.xlu0 %v2980_v9, %s2900_s20 }
  0xf4   :  { %303 = vrot.lane.b32.xlu1 %v2993_v12, %s2897_s3 }
  0xf6   :  { %354 = vrot.lane.b32.xlu0 %v2993_v12, %s2901_s22 }
  0xf8   :  { %384 = vrot.lane.b32.xlu1 %v368_v14, %s2902_s23 }
  0xfa   :  { %241 = vrot.lane.b32.xlu0 %v2970_v4, %s2903_s24 }
  0xfc   :  { %386 = vrot.lane.b32.xlu1 %v369_v15, %s2902_s23 }
  0xfe   :  { %292 = vrot.lane.b32.xlu0 %v2970_v4, %s2901_s22 }
 0x15a   :  { %v3003_v16 = vpop.permute.xlu1 %154 }
 0x15b   :  { %v371_v31 = vmul.f32 %v366_v13, %v3003_v16 }
 0x15c   :  { %v3005_v17 = vpop.permute.xlu0 %152 }
 0x15d   :  { %v370_v18 = vmul.f32 %v366_v13, %v3005_v17 }
 0x15e   :  { %v3008_v19 = vpop.permute.xlu1 %158 }
 0x15f   :  { %388 = vrot.lane.b32.xlu0 %v370_v18, %s2902_s23  ;;  %v372_v21 = vmul.f32 %v366_v13, %v3008_v19 }
 0x160   :  { %v3011_v20 = vpop.permute.xlu0 %160 }
 0x161   :  { %v373_v33 = vmul.f32 %v366_v13, %v3011_v20 }
 0x162   :  { %v3014_v22 = vpop.permute.xlu1 %164 }
 0x163   :  { %392 = vrot.lane.b32.xlu0 %v372_v21, %s2902_s23  ;;  %v374_v24 = vmul.f32 %v366_v13, %v3014_v22 }
 0x164   :  { %v3017_v23 = vpop.permute.xlu0 %166 }
 0x165   :  { %v375_v35 = vmul.f32 %v366_v13, %v3017_v23 }
 0x166   :  { %v304_v25 = vpop.permute.xlu1 %303 }
 0x167   :  { %396 = vrot.lane.b32.xlu0 %v374_v24, %s2902_s23  ;;  %v306_v26 = vmul.f32 %v304_v25, %v2982_v11  ;;  %v308_v32 = vmul.f32 %v304_v25, %v3005_v17  ;;  %v310_v34 = vmul.f32 %v304_v25, %v3008_v19  ;;  %v312_v36 = vmul.f32 %v304_v25, %v3014_v22 }
 0x168   :  { %v3022_v27 = vpop.permute.xlu0 %354  ;;  %v307_v39 = vmul.f32 %v304_v25, %v2980_v9  ;;  %v309_v41 = vmul.f32 %v304_v25, %v3003_v16  ;;  %v311_v42 = vmul.f32 %v304_v25, %v3011_v20  ;;  %v313_v43 = vmul.f32 %v304_v25, %v3017_v23 }
 0x169   :  { %322 = vrot.lane.b32.xlu1 %v306_v26, %s2902_s23  ;;  %v357_v28 = vmul.f32 %v3022_v27, %v2982_v11  ;;  %v358_v38 = vmul.f32 %v3022_v27, %v2980_v9  ;;  %v360_v8 = vmul.f32 %v3022_v27, %v3003_v16  ;;  %v362_v14 = vmul.f32 %v3022_v27, %v3011_v20 }
 0x16a   :  { %v385_v29 = vpop.permute.xlu1 %384  ;;  %v364_v21 = vmul.f32 %v3022_v27, %v3017_v23 }
 0x16b   :  { %v3027_v30 = vadd.f32 %v385_v29, %v357_v28  ;;  %181 = vrot.lane.b32.xlu0 %v2993_v12, %s2903_s24 }
 0x16c   :  { %v242_v44 = vpop.permute.xlu0 %241 }
 0x16d   :  { %390 = vrot.lane.b32.xlu1 %v371_v31, %s2902_s23  ;;  %v244_v45 = vmul.f32 %v242_v44, %v2982_v11  ;;  %v245_v46 = vmul.f32 %v242_v44, %v2980_v9  ;;  %v247_v47 = vmul.f32 %v242_v44, %v3003_v16  ;;  %v249_v48 = vmul.f32 %v242_v44, %v3011_v20 }
 0x16e   :  { %v387_v37 = vpop.permute.xlu1 %386  ;;  %v251_v49 = vmul.f32 %v242_v44, %v3017_v23  ;;  %v246_v0 = vmul.f32 %v242_v44, %v3005_v17  ;;  %v248_v3 = vmul.f32 %v242_v44, %v3008_v19  ;;  %v250_v6 = vmul.f32 %v242_v44, %v3014_v22 }
 0x16f   :  { %326 = vrot.lane.b32.xlu0 %v308_v32, %s2902_s23  ;;  %v409_v40 = vadd.f32 %v387_v37, %v358_v38  ;;  %v359_v31 = vmul.f32 %v3022_v27, %v3005_v17 }
 0x170   :  { %v3063_v50 = vpop.permute.xlu0 %292 }
 0x171   :  { %394 = vrot.lane.b32.xlu1 %v373_v33, %s2902_s23  ;;  %v296_v63 = vmul.f32 %v3063_v50, %v2980_v9  ;;  %v295_v5 = vmul.f32 %v3063_v50, %v2982_v11  ;;  %v298_v28 = vmul.f32 %v3063_v50, %v3003_v16  ;;  %v299_v44 = vmul.f32 %v3063_v50, %v3008_v19 }
 0x173   :  { %330 = vrot.lane.b32.xlu0 %v310_v34, %s2902_s23  ;;  %v361_v34 = vmul.f32 %v3022_v27, %v3008_v19 }
 0x175   :  { %398 = vrot.lane.b32.xlu1 %v375_v35, %s2902_s23 }
 0x177   :  { %334 = vrot.lane.b32.xlu0 %v312_v36, %s2902_s23  ;;  %v363_v36 = vmul.f32 %v3022_v27, %v3014_v22  ;;  %v297_v27 = vmul.f32 %v3063_v50, %v3005_v17 }
 0x179   :  { %324 = vrot.lane.b32.xlu1 %v307_v39, %s2902_s23 }
 0x17b   :  { %496 = vrot.lane.b32.xlu0 %v409_v40, %s2904_s6  ;;  %v300_v40 = vmul.f32 %v3063_v50, %v3011_v20 }
 0x17d   :  { %328 = vrot.lane.b32.xlu1 %v309_v41, %s2902_s23 }
 0x181   :  { %332 = vrot.lane.b32.xlu1 %v311_v42, %s2902_s23 }
 0x185   :  { %336 = vrot.lane.b32.xlu1 %v313_v43, %s2902_s23 }
 0x189   :  { %260 = vrot.lane.b32.xlu1 %v244_v45, %s2902_s23 }
 0x18d   :  { %262 = vrot.lane.b32.xlu1 %v245_v46, %s2902_s23 }
 0x191   :  { %266 = vrot.lane.b32.xlu1 %v247_v47, %s2902_s23  ;;  %v301_v47 = vmul.f32 %v3063_v50, %v3014_v22 }
 0x195   :  { %270 = vrot.lane.b32.xlu1 %v249_v48, %s2902_s23 }
 0x199   :  { %274 = vrot.lane.b32.xlu1 %v251_v49, %s2902_s23 }
 0x1d1   :  { %v389_v51 = vpop.permute.xlu0 %388 }
 0x1d2   :  { %v410_v33 = vadd.f32 %v389_v51, %v359_v31  ;;  %v302_v51 = vmul.f32 %v3063_v50, %v3017_v23 }
 0x1d5   :  { %v393_v52 = vpop.permute.xlu0 %392 }
 0x1d6   :  { %v412_v35 = vadd.f32 %v393_v52, %v361_v34  ;;  %v238_v34 = vmul.f32 %v2993_v12, %v3014_v22 }
 0x1d9   :  { %v3065_v53 = vpop.permute.xlu0 %396 }
 0x1da   :  { %v414_v37 = vadd.f32 %v3065_v53, %v363_v36 }
 0x1db   :  { %v323_v54 = vpop.permute.xlu1 %322 }
 0x1dc   :  { %v346_v7 = vsub.f32 %v295_v5, %v323_v54 }
 0x1dd   :  { %v182_v55 = vpop.permute.xlu0 %181 }
 0x1de   :  { %v184_v56 = vmul.f32 %v182_v55, %v2982_v11  ;;  %v185_v58 = vmul.f32 %v182_v55, %v2980_v9  ;;  %v187_v61 = vmul.f32 %v182_v55, %v3003_v16  ;;  %v186_v10 = vmul.f32 %v182_v55, %v3005_v17 }
 0x1df   :  { %v391_v57 = vpop.permute.xlu1 %390  ;;  %v188_v15 = vmul.f32 %v182_v55, %v3008_v19  ;;  %v189_v24 = vmul.f32 %v182_v55, %v3011_v20  ;;  %v190_v29 = vmul.f32 %v182_v55, %v3014_v22  ;;  %v191_v32 = vmul.f32 %v182_v55, %v3017_v23 }
 0x1e0   :  { %200 = vrot.lane.b32.xlu1 %v184_v56, %s2902_s23  ;;  %v411_v13 = vadd.f32 %v391_v57, %v360_v8 }
 0x1e1   :  { %v327_v38 = vpop.permute.xlu0 %326 }
 0x1e2   :  { %v348_v43 = vsub.f32 %v297_v27, %v327_v38 }
 0x1e3   :  { %v395_v59 = vpop.permute.xlu1 %394 }
 0x1e4   :  { %202 = vrot.lane.b32.xlu1 %v185_v58, %s2902_s23  ;;  %v413_v18 = vadd.f32 %v395_v59, %v362_v14 }
 0x1e5   :  { %v331_v42 = vpop.permute.xlu0 %330 }
 0x1e6   :  { %v350_v45 = vsub.f32 %v299_v44, %v331_v42 }
 0x1e7   :  { %v399_v62 = vpop.permute.xlu1 %398 }
 0x1e8   :  { %206 = vrot.lane.b32.xlu1 %v187_v61, %s2902_s23  ;;  %v415_v25 = vadd.f32 %v399_v62, %v364_v21  ;;  %v234_v21 = vmul.f32 %v2993_v12, %v3005_v17 }
 0x1e9   :  { %v335_v46 = vpop.permute.xlu0 %334 }
 0x1ea   :  { %v352_v48 = vsub.f32 %v301_v47, %v335_v46 }
 0x1eb   :  { %v325_v1 = vpop.permute.xlu1 %324 }
 0x1ec   :  { %v347_v2 = vsub.f32 %v296_v63, %v325_v1  ;;  %264 = vrot.lane.b32.xlu1 %v246_v0, %s2902_s23  ;;  %v232_v63 = vmul.f32 %v2993_v12, %v2982_v11 }
 0x1ed   :  { %v497_v50 = vpop.permute.xlu0 %496 }
 0x1ee   :  { %1120 = vrot.lane.b32.xlu0 %v347_v2, %s2904_s6  ;;  %v233_v2 = vmul.f32 %v2993_v12, %v2980_v9 }
 0x1ef   :  { %v329_v26 = vpop.permute.xlu1 %328 }
 0x1f0   :  { %268 = vrot.lane.b32.xlu1 %v248_v3, %s2902_s23 }
 0x1f2   :  { %417 = vrot.lane.b32.xlu0 %v3027_v30, %s2904_s6  ;;  %v349_v30 = vsub.f32 %v298_v28, %v329_v26  ;;  %v235_v26 = vmul.f32 %v2993_v12, %v3003_v16  ;;  %v236_v28 = vmul.f32 %v2993_v12, %v3008_v19 }
 0x1f3   :  { %v333_v39 = vpop.permute.xlu1 %332 }
 0x1f4   :  { %272 = vrot.lane.b32.xlu1 %v250_v6, %s2902_s23  ;;  %v351_v41 = vsub.f32 %v300_v40, %v333_v39  ;;  %v239_v39 = vmul.f32 %v2993_v12, %v3017_v23  ;;  %v172_v40 = vmul.f32 %v2970_v4, %v2982_v11 }
 0x1f6   :  { %1042 = vrot.lane.b32.xlu0 %v346_v7, %s2904_s6 }
 0x1f7   :  { %v337_v49 = vpop.permute.xlu1 %336 }
 0x1f8   :  { %204 = vrot.lane.b32.xlu1 %v186_v10, %s2902_s23  ;;  %v353_v52 = vsub.f32 %v302_v51, %v337_v49 }
 0x1fa   :  { %652 = vrot.lane.b32.xlu0 %v411_v13, %s2904_s6 }
 0x1fb   :  { %v261_v53 = vpop.permute.xlu1 %260 }
 0x1fc   :  { %208 = vrot.lane.b32.xlu1 %v188_v15, %s2902_s23  ;;  %v284_v1 = vadd.f32 %v261_v53, %v232_v63 }
 0x1fe   :  { %808 = vrot.lane.b32.xlu0 %v413_v18, %s2904_s6 }
 0x1ff   :  { %v263_v54 = vpop.permute.xlu1 %262 }
 0x200   :  { %210 = vrot.lane.b32.xlu1 %v189_v24, %s2902_s23  ;;  %v285_v6 = vadd.f32 %v263_v54, %v233_v2  ;;  %v1665_v2 = vlaneseq }
 0x202   :  { %964 = vrot.lane.b32.xlu0 %v415_v25, %s2904_s6 }
 0x203   :  { %v267_v55 = vpop.permute.xlu1 %266 }
 0x204   :  { %212 = vrot.lane.b32.xlu1 %v190_v29, %s2902_s23  ;;  %v287_v31 = vadd.f32 %v267_v55, %v235_v26 }
 0x206   :  { %1276 = vrot.lane.b32.xlu0 %v349_v30, %s2904_s6 }
 0x207   :  { %v271_v56 = vpop.permute.xlu1 %270 }
 0x208   :  { %214 = vrot.lane.b32.xlu1 %v191_v32, %s2902_s23 }
 0x20a   :  { %574 = vrot.lane.b32.xlu0 %v410_v33, %s2904_s6  ;;  %v237_v33 = vmul.f32 %v2993_v12, %v3011_v20  ;;  %v174_v12 = vmul.f32 %v2970_v4, %v3005_v17 }
 0x20b   :  { %v3152_v57 = vpop.permute.xlu1 %274 }
 0x20c   :  { %1753 = vrot.lane.b32.xlu1 %v2982_v11, %s2907_s25  ;;  %v289_v36 = vadd.f32 %v271_v56, %v237_v33  ;;  %v291_v27 = vadd.f32 %v3152_v57, %v239_v39  ;;  %v173_v11 = vmul.f32 %v2970_v4, %v2980_v9 }
 0x20e   :  { %730 = vrot.lane.b32.xlu0 %v412_v35, %s2904_s6 }
 0x210   :  { %1905 = vrot.lane.b32.xlu1 %v3005_v17, %s2907_s25  ;;  %v176_v17 = vmul.f32 %v2970_v4, %v3008_v19 }
 0x212   :  { %886 = vrot.lane.b32.xlu0 %v414_v37, %s2904_s6 }
 0x214   :  { %1981 = vrot.lane.b32.xlu1 %v3003_v16, %s2907_s25 }
 0x216   :  { %1432 = vrot.lane.b32.xlu0 %v351_v41, %s2904_s6 }
 0x218   :  { %2133 = vrot.lane.b32.xlu1 %v3011_v20, %s2907_s25 }
 0x21a   :  { %1198 = vrot.lane.b32.xlu0 %v348_v43, %s2904_s6 }
 0x21e   :  { %1354 = vrot.lane.b32.xlu0 %v350_v45, %s2904_s6 }
 0x222   :  { %1510 = vrot.lane.b32.xlu0 %v352_v48, %s2904_s6 }
 0x226   :  { %1588 = vrot.lane.b32.xlu0 %v353_v52, %s2904_s6 }
 0x22a   :  { %1829 = vrot.lane.b32.xlu0 %v2980_v9, %s2907_s25  ;;  %v175_v9 = vmul.f32 %v2970_v4, %v3003_v16  ;;  %v177_v16 = vmul.f32 %v2970_v4, %v3011_v20  ;;  %v179_v20 = vmul.f32 %v2970_v4, %v3017_v23 }
 0x22e   :  { %2057 = vrot.lane.b32.xlu0 %v3008_v19, %s2907_s25  ;;  %v178_v19 = vmul.f32 %v2970_v4, %v3014_v22 }
 0x252   :  { %v3154_v58 = vpop.permute.xlu1 %200 }
 0x253   :  { %v224_v42 = vsub.f32 %v172_v40, %v3154_v58 }
 0x256   :  { %v3156_v59 = vpop.permute.xlu1 %202 }
 0x257   :  { %v225_v45 = vsub.f32 %v173_v11, %v3156_v59 }
 0x25a   :  { %v3160_v62 = vpop.permute.xlu1 %206 }
 0x25b   :  { %v227_v48 = vsub.f32 %v175_v9, %v3160_v62 }
 0x25e   :  { %v265_v3 = vpop.permute.xlu1 %264 }
 0x25f   :  { %v286_v25 = vadd.f32 %v265_v3, %v234_v21 }
 0x260   :  { %v3158_v61 = vpop.permute.xlu0 %1120 }
 0x262   :  { %v269_v8 = vpop.permute.xlu1 %268 }
 0x263   :  { %v288_v32 = vadd.f32 %v269_v8, %v236_v28  ;;  %v1666_v8 = vshrl.u32 %v1665_v2, 7 }
 0x264   :  { %v418_v0 = vpop.permute.xlu0 %417 }
 0x265   :  { %2647 = vmatpush3.xpose.msk.msra.mxu1 %vm419_vm2, %v418_v0 }
 0x266   :  { %2651 = vmatprep.subr.mxu1 %v2905_v60  ;;  %v273_v13 = vpop.permute.xlu1 %272 }
 0x267   :  { %v290_v37 = vadd.f32 %v273_v13, %v238_v34 }
 0x268   :  { %v1043_v5 = vpop.permute.xlu0 %1042  ;;  %2649 = vmatmul.mubr.msk.f32.vlgmr.msra.gmra.mxu1 %vm419_vm2, %v284_v1 }
 0x269   :  { %2652 = vmatpush3.xpose.msk.msra.mxu1 %vm419_vm2, %v497_v50  ;;  %2653 = vmatprep.mubr.msk.f32.mxu1 %vm2906_vm1, %v2905_v60 }
 0x26a   :  { %2656 = vmatprep.subr.mxu1 %v2905_v60  ;;  %v3178_v18 = vpop.permute.xlu1 %204 }
 0x26b   :  { %v226_v46 = vsub.f32 %v174_v12, %v3178_v18 }
 0x26c   :  { %v653_v7 = vpop.permute.xlu0 %652  ;;  %2654 = vmatmul.mubr.msk.f32.vlgmr.msra.gmra.mxu1 %vm419_vm2, %v285_v6 }
 0x26d   :  { %2658 = vmatprep.mubr.msk.f32.mxu1 %vm2906_vm1, %v2905_v60 }
 0x26e   :  { %v3188_v29 = vpop.permute.xlu1 %208 }
 0x26f   :  { %v228_v49 = vsub.f32 %v176_v17, %v3188_v29 }
 0x270   :  { %v809_v10 = vpop.permute.xlu0 %808 }
 0x272   :  { %v3205_v38 = vpop.permute.xlu1 %210 }
 0x273   :  { %v229_v53 = vsub.f32 %v177_v16, %v3205_v38 }
 0x274   :  { %v965_v14 = vpop.permute.xlu0 %964 }
 0x276   :  { %v213_v43 = vpop.permute.xlu1 %212 }
 0x277   :  { %v230_v54 = vsub.f32 %v178_v19, %v213_v43 }
 0x278   :  { %v3176_v15 = vpop.permute.xlu0 %1276 }
 0x27a   :  { %v215_v51 = vpop.permute.xlu1 %214 }
 0x27b   :  { %v231_v57 = vsub.f32 %v179_v20, %v215_v51 }
 0x27c   :  { %v575_v24 = vpop.permute.xlu0 %574 }
 0x27d   :  { %2657 = vmatpush3.xpose.msk.msra.mxu1 %vm419_vm2, %v575_v24 }
 0x27e   :  { %2661 = vmatprep.subr.mxu1 %v2905_v60  ;;  %v1754_v55 = vpop.permute.xlu1 %1753 }
 0x280   :  { %v731_v30 = vpop.permute.xlu0 %730  ;;  %2659 = vmatmul.mubr.msk.f32.vlgmr.msra.gmra.mxu1 %vm419_vm2, %v286_v25 }
 0x281   :  { %2662 = vmatpush3.xpose.msk.msra.mxu1 %vm419_vm2, %v653_v7  ;;  %2667 = vmatpush3.xpose.msk.msra.mxu0 %vm419_vm2, %v731_v30 }
 0x282   :  { %2663 = vmatprep.mubr.msk.f32.mxu1 %vm2906_vm1, %v2905_v60  ;;  %2676 = vmatprep.subr.mxu0 %v2905_v60 }
 0x283   :  { %2671 = vmatprep.subr.mxu1 %v2905_v60 }
 0x284   :  { %v887_v35 = vpop.permute.xlu0 %886  ;;  %2664 = vmatmul.mubr.msk.f32.vlgmr.msra.gmra.mxu1 %vm419_vm2, %v287_v31  ;;  %2669 = vmatmul.mubr.msk.f32.vlgmr.msra.gmra.mxu0 %vm419_vm2, %v288_v32 }
 0x285   :  { %2672 = vmatpush3.xpose.msk.msra.mxu1 %vm419_vm2, %v809_v10  ;;  %2677 = vmatpush3.xpose.msk.msra.mxu0 %vm419_vm2, %v887_v35  ;;  %v1668_v10 = vand.u32 127, %v1665_v2 }
 0x286   :  { %2673 = vmatprep.mubr.msk.f32.mxu1 %vm2906_vm1, %v2905_v60  ;;  %2678 = vmatprep.mubr.msk.f32.mxu0 %vm2906_vm1, %v2905_v60 }
 0x287   :  { %2681 = vmatprep.subr.mxu1 %v2905_v60  ;;  %2686 = vmatprep.subr.mxu0 %v2905_v60  ;;  %vm3293_vm3 = vcmp.le.s32.totalorder %v1668_v10, %v1666_v8 }
 0x288   :  { %v1433_v41 = vpop.permute.xlu0 %1432  ;;  %2674 = vmatmul.mubr.msk.f32.vlgmr.msra.gmra.mxu1 %vm419_vm2, %v289_v36  ;;  %2679 = vmatmul.mubr.msk.f32.vlgmr.msra.gmra.mxu0 %vm419_vm2, %v290_v37 }
 0x289   :  { %2682 = vmatpush3.xpose.msk.msra.mxu1 %vm419_vm2, %v965_v14  ;;  %2687 = vmatpush3.xpose.msk.msra.mxu0 %vm419_vm2, %v1043_v5 }
 0x28a   :  { %2683 = vmatprep.mubr.msk.f32.mxu1 %vm2906_vm1, %v2905_v60  ;;  %2688 = vmatprep.mubr.msk.f32.mxu0 %vm2906_vm1, %v2905_v60 }
 0x28b   :  { %2691 = vmatprep.subr.mxu1 %v2905_v60  ;;  %2696 = vmatprep.subr.mxu0 %v2905_v60 }
 0x28c   :  { %v1199_v44 = vpop.permute.xlu0 %1198  ;;  %2684 = vmatmul.mubr.msk.f32.vlgmr.msra.gmra.mxu1 %vm419_vm2, %v291_v27  ;;  %2689 = vmatmul.mubr.msk.f32.vlgmr.msra.gmra.mxu0 %vm419_vm2, %v224_v42 }
 0x28d   :  { %2692 = vmatpush3.xpose.msk.msra.mxu1 %vm419_vm2, %v3158_v61  ;;  %2697 = vmatpush3.xpose.msk.msra.mxu0 %vm419_vm2, %v1199_v44 }
 0x28e   :  { %2693 = vmatprep.mubr.msk.f32.mxu1 %vm2906_vm1, %v2905_v60  ;;  %2698 = vmatprep.mubr.msk.f32.mxu0 %vm2906_vm1, %v2905_v60 }
 0x28f   :  { %2701 = vmatprep.subr.mxu1 %v2905_v60  ;;  %2706 = vmatprep.subr.mxu0 %v2905_v60 }
 0x290   :  { %v1355_v47 = vpop.permute.xlu0 %1354  ;;  %2694 = vmatmul.mubr.msk.f32.vlgmr.msra.gmra.mxu1 %vm419_vm2, %v225_v45  ;;  %2699 = vmatmul.mubr.msk.f32.vlgmr.msra.gmra.mxu0 %vm419_vm2, %v226_v46 }
 0x291   :  { %2702 = vmatpush3.xpose.msk.msra.mxu1 %vm419_vm2, %v3176_v15  ;;  %2707 = vmatpush3.xpose.msk.msra.mxu0 %vm419_vm2, %v1355_v47 }
 0x292   :  { %2703 = vmatprep.mubr.msk.f32.mxu1 %vm2906_vm1, %v2905_v60  ;;  %2708 = vmatprep.mubr.msk.f32.mxu0 %vm2906_vm1, %v2905_v60 }
 0x293   :  { %2711 = vmatprep.subr.mxu1 %v2905_v60  ;;  %2716 = vmatprep.subr.mxu0 %v2905_v60 }
 0x294   :  { %v1511_v52 = vpop.permute.xlu0 %1510  ;;  %2704 = vmatmul.mubr.msk.f32.vlgmr.msra.gmra.mxu1 %vm419_vm2, %v227_v48  ;;  %2709 = vmatmul.mubr.msk.f32.vlgmr.msra.gmra.mxu0 %vm419_vm2, %v228_v49 }
 0x295   :  { %2712 = vmatpush3.xpose.msk.msra.mxu1 %vm419_vm2, %v1433_v41  ;;  %2717 = vmatpush3.xpose.msk.msra.mxu0 %vm419_vm2, %v1511_v52 }
 0x296   :  { %2713 = vmatprep.mubr.msk.f32.mxu1 %vm2906_vm1, %v2905_v60  ;;  %2718 = vmatprep.mubr.msk.f32.mxu0 %vm2906_vm1, %v2905_v60 }
 0x297   :  { %2721 = vmatprep.subr.mxu1 %v2905_v60  ;;  %2726 = vmatprep.subr.mxu0 %v2905_v60 }
 0x298   :  { %v1589_v56 = vpop.permute.xlu0 %1588  ;;  %2714 = vmatmul.mubr.msk.f32.vlgmr.msra.gmra.mxu1 %vm419_vm2, %v229_v53  ;;  %2719 = vmatmul.mubr.msk.f32.vlgmr.msra.gmra.mxu0 %vm419_vm2, %v230_v54 }
 0x299   :  { %2722 = vmatpush3.xpose.msk.msra.mxu1 %vm419_vm2, %v1589_v56  ;;  %2727 = vmatpush3.msra.mxu0 %v1754_v55 }
 0x29a   :  { %2723 = vmatprep.mubr.msk.f32.mxu1 %vm2906_vm1, %v2905_v60  ;;  %2731 = vmatprep.subr.mxu1 %v2905_v60 }
 0x29b   :  { %2728 = vmatprep.mubr.msk.f32.mxu0 %vm2906_vm1, %v2905_v60  ;;  %2736 = vmatprep.subr.mxu0 %v2905_v60 }
 0x29c   :  { %v1830_v4 = vpop.permute.xlu0 %1829  ;;  %2724 = vmatmul.mubr.msk.f32.vlgmr.msra.gmra.mxu1 %vm419_vm2, %v231_v57 }
 0x29d   :  { %2732 = vmatpush3.msra.mxu1 %v1830_v4  ;;  %2733 = vmatprep.mubr.msk.f32.mxu1 %vm2906_vm1, %v2905_v60  ;;  %v1906_v4 = vpop.permute.xlu1 %1905 }
 0x29e   :  { %2741 = vmatprep.subr.mxu1 %v2905_v60 }
 0x328   :  { %v491_v58 = vpop.f32.mrf.mxu1 }
 0x32a   :  { %v2650_v50 = vpop.f32.mrf.mxu1 }
 0x32b   :  { %v2058_v50 = vpop.permute.xlu0 %2057 }
 0x32c   :  { %v569_v59 = vpop.f32.mrf.mxu1 }
 0x32e   :  { %v2655_v61 = vpop.f32.mrf.mxu1 }
 0x340   :  { %v647_v62 = vpop.f32.mrf.mxu1 }
 0x342   :  { %v2660_v63 = vpop.f32.mrf.mxu1 }
 0x344   :  { %v725_v0 = vpop.f32.mrf.mxu1  ;;  %v803_v1 = vpop.f32.mrf.mxu0 }
 0x346   :  { %v2665_v3 = vpop.f32.mrf.mxu1  ;;  %v2670_v5 = vpop.f32.mrf.mxu0 }
 0x348   :  { %v881_v6 = vpop.f32.mrf.mxu1  ;;  %v959_v7 = vpop.f32.mrf.mxu0 }
 0x34a   :  { %v2675_v13 = vpop.f32.mrf.mxu1  ;;  %v2680_v14 = vpop.f32.mrf.mxu0 }
 0x34c   :  { %v1037_v15 = vpop.f32.mrf.mxu1  ;;  %v1115_v18 = vpop.f32.mrf.mxu0 }
 0x34d   :  { %v1116_v24 = vadd.f32 %v1115_v18, %v491_v58  ;;  %v1982_v58 = vpop.permute.xlu1 %1981 }
 0x34e   :  { %v2685_v25 = vpop.f32.mrf.mxu1  ;;  %v2690_v26 = vpop.f32.mrf.mxu0 }
 0x34f   :  { %v1672_v28 = vsel %vm3293_vm3, %v1116_v24, -1e+10 }
 0x350   :  { %v1193_v29 = vpop.f32.mrf.mxu1  ;;  %v1271_v30 = vpop.f32.mrf.mxu0  ;;  %v1681_v31 = vsel %vm1680_vm4, %v1672_v28, -inf }
 0x351   :  { %v1194_v32 = vadd.f32 %v1193_v29, %v569_v59  ;;  %v1272_v33 = vadd.f32 %v1271_v30, %v647_v62  ;;  %1682 = vmax.xlane.f32.xlu0 %v1681_v31  ;;  %v2134_v59 = vpop.permute.xlu1 %2133 }
 0x352   :  { %v2695_v34 = vpop.f32.mrf.mxu1  ;;  %v2700_v35 = vpop.f32.mrf.mxu0 }
 0x353   :  { %v1673_v36 = vsel %vm3293_vm3, %v1194_v32, -1e+10  ;;  %v1674_v37 = vsel %vm3293_vm3, %v1272_v33, -1e+10 }
 0x354   :  { %v1349_v38 = vpop.f32.mrf.mxu1  ;;  %v1427_v39 = vpop.f32.mrf.mxu0  ;;  %v1684_v40 = vsel %vm1680_vm4, %v1673_v36, -inf  ;;  %v1687_v41 = vsel %vm1680_vm4, %v1674_v37, -inf }
 0x355   :  { %v1350_v27 = vadd.f32 %v1349_v38, %v725_v0  ;;  %v1428_v42 = vadd.f32 %v1427_v39, %v803_v1  ;;  %1685 = vmax.xlane.f32.xlu1 %v1684_v40  ;;  %1688 = vmax.xlane.f32.xlu0 %v1687_v41 }
 0x356   :  { %v2705_v11 = vpop.f32.mrf.mxu1  ;;  %v2710_v12 = vpop.f32.mrf.mxu0 }
 0x357   :  { %v1675_v43 = vsel %vm3293_vm3, %v1350_v27, -1e+10  ;;  %v1676_v44 = vsel %vm3293_vm3, %v1428_v42, -1e+10 }
 0x358   :  { %v1505_v45 = vpop.f32.mrf.mxu1  ;;  %v1583_v46 = vpop.f32.mrf.mxu0  ;;  %v1690_v9 = vsel %vm1680_vm4, %v1675_v43, -inf  ;;  %v1693_v17 = vsel %vm1680_vm4, %v1676_v44, -inf }
 0x359   :  { %v1506_v47 = vadd.f32 %v1505_v45, %v881_v6  ;;  %v1584_v48 = vadd.f32 %v1583_v46, %v959_v7  ;;  %1691 = vmax.xlane.f32.xlu0 %v1690_v9  ;;  %1694 = vmax.xlane.f32.xlu1 %v1693_v17 }
 0x35a   :  { %v2715_v49 = vpop.f32.mrf.mxu1  ;;  %v2720_v51 = vpop.f32.mrf.mxu0 }
 0x35b   :  { %v1677_v16 = vsel %vm3293_vm3, %v1506_v47, -1e+10  ;;  %v1678_v19 = vsel %vm3293_vm3, %v1584_v48, -1e+10  ;;  %v2419_v48 = vld [vmem:[#allocation5 + $0x10] sm:$0xff] }
 0x35c   :  { %v1661_v52 = vpop.f32.mrf.mxu1  ;;  %v1696_v53 = vsel %vm1680_vm4, %v1677_v16, -inf  ;;  %v1699_v54 = vsel %vm1680_vm4, %v1678_v19, -inf }
 0x35d   :  { %v1662_v20 = vadd.f32 %v1661_v52, %v1037_v15  ;;  %1697 = vmax.xlane.f32.xlu0 %v1696_v53  ;;  %1700 = vmax.xlane.f32.xlu1 %v1699_v54  ;;  %v2418_v52 = vld [vmem:[#allocation5 + $0x8] sm:$0xff] }
 0x35e   :  { %v2725_v55 = vpop.f32.mrf.mxu1 }
 0x35f   :  { %v1679_v56 = vsel %vm3293_vm3, %v1662_v20, -1e+10  ;;  %v2417_v20 = vld [vmem:[#allocation5] sm:$0xff] }
 0x360   :  { %v1702_v57 = vsel %vm1680_vm4, %v1679_v56, -inf }
 0x361   :  { %1703 = vmax.xlane.f32.xlu0 %v1702_v57 }
 0x36e   :  { %2285 = vrot.lane.b32.xlu1 %v3017_v23, %s2907_s25 }
 0x377   :  { %2209 = vrot.lane.b32.xlu0 %v3014_v22, %s2907_s25 }
 0x3da   :  { %v1683_v61 = vpop.xlane.xlu0 %1682 }
 0x3db   :  { %v1705_v62 = vsub.f32 %v1672_v28, %v1683_v61 }
 0x3dd   :  { %v1713_v63 = vmul.f32 1.442695, %v1705_v62 }
 0x3de   :  { %v1686_v0 = vpop.xlane.xlu1 %1685  ;;  %v1689_v1 = vpop.xlane.xlu0 %1688 }
 0x3df   :  { %2795 = vpow2.f32 %v1713_v63  ;;  %v1706_v2 = vsub.f32 %v1673_v36, %v1686_v0  ;;  %v1707_v3 = vsub.f32 %v1674_v37, %v1689_v1 }
 0x3e1   :  { %v1715_v5 = vmul.f32 1.442695, %v1706_v2  ;;  %v1717_v6 = vmul.f32 1.442695, %v1707_v3 }
 0x3e2   :  { %v1692_v7 = vpop.xlane.xlu0 %1691  ;;  %v1695_v8 = vpop.xlane.xlu1 %1694 }
 0x3e3   :  { %2797 = vpow2.f32 %v1715_v5  ;;  %v1708_v23 = vsub.f32 %v1675_v43, %v1692_v7  ;;  %v1709_v10 = vsub.f32 %v1676_v44, %v1695_v8 }
 0x3e4   :  { %2799 = vpow2.f32 %v1717_v6 }
 0x3e5   :  { %v1719_v22 = vmul.f32 1.442695, %v1708_v23  ;;  %v1721_v13 = vmul.f32 1.442695, %v1709_v10 }
 0x3e6   :  { %v1698_v14 = vpop.xlane.xlu0 %1697  ;;  %v1701_v15 = vpop.xlane.xlu1 %1700 }
 0x3e7   :  { %2801 = vpow2.f32 %v1719_v22  ;;  %v1710_v18 = vsub.f32 %v1677_v16, %v1698_v14  ;;  %v1711_v21 = vsub.f32 %v1678_v19, %v1701_v15 }
 0x3e8   :  { %2803 = vpow2.f32 %v1721_v13 }
 0x3e9   :  { %v1723_v24 = vmul.f32 1.442695, %v1710_v18  ;;  %v1725_v25 = vmul.f32 1.442695, %v1711_v21 }
 0x3ea   :  { %v1704_v26 = vpop.xlane.xlu0 %1703  ;;  %v2286_v27 = vpop.permute.xlu1 %2285 }
 0x3eb   :  { %2805 = vpow2.f32 %v1723_v24  ;;  %v1712_v28 = vsub.f32 %v1679_v56, %v1704_v26 }
 0x3ec   :  { %v2796_v29 = vpop.eup %2795  ;;  %2807 = vpow2.f32 %v1725_v25 }
 0x3ed   :  { %v1727_v30 = vmul.f32 1.442695, %v1712_v28  ;;  %2729 = vmatmul.mubr.msk.f32.vlgmr.msra.gmra.mxu0 %vm1680_vm4, %v2796_v29  ;;  %v1729_v43 = vsel %vm1680_vm4, %v2796_v29, 0.0 }
 0x3ee   :  { %2737 = vmatpush3.msra.mxu0 %v1906_v4  ;;  %2738 = vmatprep.mubr.msk.f32.mxu0 %vm2906_vm1, %v2905_v60  ;;  %v2210_v37 = vpop.permute.xlu0 %2209 }
 0x3ef   :  { %2809 = vpow2.f32 %v1727_v30  ;;  %2746 = vmatprep.subr.mxu0 %v2905_v60 }
 0x3f0   :  { %v2798_v31 = vpop.eup %2797 }
 0x3f1   :  { %v2800_v32 = vpop.eup %2799  ;;  %2734 = vmatmul.mubr.msk.f32.vlgmr.msra.gmra.mxu1 %vm1680_vm4, %v2798_v31  ;;  %v1732_v44 = vsel %vm1680_vm4, %v2798_v31, 0.0 }
 0x3f2   :  { %2739 = vmatmul.mubr.msk.f32.vlgmr.msra.gmra.mxu0 %vm1680_vm4, %v2800_v32  ;;  %2742 = vmatpush3.msra.mxu1 %v1982_v58  ;;  %v1735_v33 = vsel %vm1680_vm4, %v2800_v32, 0.0 }
 0x3f3   :  { %2747 = vmatpush3.msra.mxu0 %v2058_v50  ;;  %1736 = vadd.xlane.f32.xlu0 %v1735_v33 }
 0x3f4   :  { %v2802_v34 = vpop.eup %2801  ;;  %2743 = vmatprep.mubr.msk.f32.mxu1 %vm2906_vm1, %v2905_v60  ;;  %2748 = vmatprep.mubr.msk.f32.mxu0 %vm2906_vm1, %v2905_v60 }
 0x3f5   :  { %v2804_v35 = vpop.eup %2803  ;;  %2751 = vmatprep.subr.mxu1 %v2905_v60  ;;  %2756 = vmatprep.subr.mxu0 %v2905_v60  ;;  %v1738_v36 = vsel %vm1680_vm4, %v2802_v34, 0.0 }
 0x3f6   :  { %2744 = vmatmul.mubr.msk.f32.vlgmr.msra.gmra.mxu1 %vm1680_vm4, %v2802_v34  ;;  %2749 = vmatmul.mubr.msk.f32.vlgmr.msra.gmra.mxu0 %vm1680_vm4, %v2804_v35  ;;  %v1741_v38 = vsel %vm1680_vm4, %v2804_v35, 0.0 }
 0x3f7   :  { %2752 = vmatpush3.msra.mxu1 %v2134_v59  ;;  %2757 = vmatpush3.msra.mxu0 %v2210_v37 }
 0x3f8   :  { %v2806_v39 = vpop.eup %2805  ;;  %1742 = vadd.xlane.f32.xlu0 %v1741_v38  ;;  %1739 = vadd.xlane.f32.xlu1 %v1738_v36 }
 0x3f9   :  { %v2808_v40 = vpop.eup %2807  ;;  %2753 = vmatprep.mubr.msk.f32.mxu1 %vm2906_vm1, %v2905_v60  ;;  %2758 = vmatprep.mubr.msk.f32.mxu0 %vm2906_vm1, %v2905_v60  ;;  %v1744_v41 = vsel %vm1680_vm4, %v2806_v39, 0.0 }
 0x3fa   :  { %2761 = vmatprep.subr.mxu1 %v2905_v60  ;;  %2754 = vmatmul.mubr.msk.f32.vlgmr.msra.gmra.mxu1 %vm1680_vm4, %v2806_v39  ;;  %v1747_v42 = vsel %vm1680_vm4, %v2808_v40, 0.0 }
 0x3fb   :  { %2759 = vmatmul.mubr.msk.f32.vlgmr.msra.gmra.mxu0 %vm1680_vm4, %v2808_v40  ;;  %2762 = vmatpush3.msra.mxu1 %v2286_v27  ;;  %v2572_v40 = vld [vmem:[%s3378_s4] ss:$0 sm:$0xff] }
 0x3fc   :  { %v2810_v11 = vpop.eup %2809  ;;  %1745 = vadd.xlane.f32.xlu0 %v1744_v41  ;;  %1748 = vadd.xlane.f32.xlu1 %v1747_v42 }
 0x3fd   :  { %2763 = vmatprep.mubr.msk.f32.mxu1 %vm2906_vm1, %v2905_v60  ;;  %v1750_v12 = vsel %vm1680_vm4, %v2810_v11, 0.0  ;;  %v2420_v60 = vld [vmem:[#allocation5 + $0x18] sm:$0xff] }
 0x3fe   :  { %2764 = vmatmul.mubr.msk.f32.vlgmr.msra.gmra.mxu1 %vm1680_vm4, %v2810_v11  ;;  %2766 = vmatprep.subr.mxu0 %v2420_v60 }
 0x3ff   :  { %2767 = vmatpush3.msra.mxu0 %v2420_v60 }
 0x400   :  { %1751 = vadd.xlane.f32.xlu0 %v1750_v12  ;;  %1730 = vadd.xlane.f32.xlu1 %v1729_v43 }
 0x401   :  { %2768 = vmatprep.subr.mxu0 %v2419_v48 }
 0x402   :  { %2769 = vmatpush3.msra.mxu0 %v2419_v48 }
 0x403   :  { %2770 = vmatprep.subr.mxu0 %v2418_v52 }
 0x404   :  { %1733 = vadd.xlane.f32.xlu0 %v1732_v44  ;;  %2771 = vmatpush3.msra.mxu0 %v2418_v52 }
 0x405   :  { %2772 = vmatprep.subr.mxu0 %v2417_v20 }
 0x406   :  { %2773 = vmatpush3.msra.mxu0 %v2417_v20 }
 0x47c   :  { %v1737_v45 = vpop.xlane.xlu0 %1736 }
 0x47d   :  { %2811 = vrcp.f32 %v1737_v45 }
 0x481   :  { %v1743_v46 = vpop.xlane.xlu0 %1742  ;;  %v1740_v9 = vpop.xlane.xlu1 %1739 }
 0x482   :  { %2813 = vrcp.f32 %v1743_v46 }
 0x483   :  { %2815 = vrcp.f32 %v1740_v9 }
 0x485   :  { %v1746_v17 = vpop.xlane.xlu0 %1745  ;;  %v1749_v47 = vpop.xlane.xlu1 %1748 }
 0x486   :  { %2817 = vrcp.f32 %v1746_v17 }
 0x487   :  { %2819 = vrcp.f32 %v1749_v47 }
 0x489   :  { %v1752_v51 = vpop.xlane.xlu0 %1751  ;;  %v1731_v15 = vpop.xlane.xlu1 %1730 }
 0x48a   :  { %2821 = vrcp.f32 %v1752_v51  ;;  %v2812_v53 = vpop.eup %2811 }
 0x48b   :  { %2823 = vrcp.f32 %v1731_v15 }
 0x48d   :  { %v1734_v18 = vpop.xlane.xlu0 %1733 }
 0x48e   :  { %2825 = vrcp.f32 %v1734_v18 }
 0x48f   :  { %v2814_v4 = vpop.eup %2813 }
 0x490   :  { %v2816_v58 = vpop.eup %2815 }
 0x493   :  { %v2818_v1 = vpop.eup %2817 }
 0x494   :  { %v2820_v3 = vpop.eup %2819 }
 0x497   :  { %v2822_v10 = vpop.eup %2821 }
 0x498   :  { %v2824_v26 = vpop.eup %2823 }
 0x49b   :  { %v2826_v29 = vpop.eup %2825 }
 0x4ad   :  { %v1825_v49 = vpop.f32.mrf.mxu0 }
 0x4ae   :  { %v2377_v28 = vmul.f32 %v2824_v26, %v1825_v49 }
 0x4af   :  { %v2730_v16 = vpop.f32.mrf.mxu0 }
 0x4b1   :  { %v1901_v19 = vpop.f32.mrf.mxu1 }
 0x4b2   :  { %v1977_v54 = vpop.f32.mrf.mxu0  ;;  %v2378_v32 = vmul.f32 %v2826_v29, %v1901_v19 }
 0x4b3   :  { %v2379_v55 = vmul.f32 %v2812_v53, %v1977_v54  ;;  %v2735_v56 = vpop.f32.mrf.mxu1 }
 0x4b4   :  { %v2740_v57 = vpop.f32.mrf.mxu0 }
 0x4b5   :  { %2387 = vrot.lane.b32.xlu1 %v2379_v55, %s2895_s28 }
 0x4b6   :  { %v2053_v50 = vpop.f32.mrf.mxu1  ;;  %v2129_v59 = vpop.f32.mrf.mxu0 }
 0x4b7   :  { %v2380_v61 = vmul.f32 %v2816_v58, %v2053_v50  ;;  %v2381_v62 = vmul.f32 %v2814_v4, %v2129_v59 }
 0x4b8   :  { %v2745_v63 = vpop.f32.mrf.mxu1  ;;  %v2750_v0 = vpop.f32.mrf.mxu0 }
 0x4b9   :  { %2389 = vrot.lane.b32.xlu0 %v2380_v61, %s2895_s28  ;;  %2395 = vrot.lane.b32.xlu1 %v2381_v62, %s2908_s26 }
 0x4ba   :  { %v2205_v2 = vpop.f32.mrf.mxu1 }
 0x4bb   :  { %v2382_v5 = vmul.f32 %v2818_v1, %v2205_v2  ;;  %v2281_v6 = vpop.f32.mrf.mxu0 }
 0x4bc   :  { %v2383_v7 = vmul.f32 %v2820_v3, %v2281_v6  ;;  %v2755_v8 = vpop.f32.mrf.mxu1 }
 0x4bd   :  { %v2760_v23 = vpop.f32.mrf.mxu0  ;;  %2397 = vrot.lane.b32.xlu1 %v2382_v5, %s2908_s26 }
 0x4be   :  { %2403 = vrot.lane.b32.xlu0 %v2383_v7, %s2909_s29  ;;  %v2357_v22 = vpop.f32.mrf.mxu1 }
 0x4bf   :  { %v2384_v13 = vmul.f32 %v2822_v10, %v2357_v22 }
 0x4c0   :  { %v2765_v14 = vpop.f32.mrf.mxu1 }
 0x4c1   :  { %2405 = vrot.lane.b32.xlu1 %v2384_v13, %s2909_s29 }
 0x527   :  { %v2388_v21 = vpop.permute.xlu1 %2387 }
 0x528   :  { %v2409_v30 = vsel %vm1680_vm4, %v2377_v28, %v2388_v21 }
 0x52b   :  { %v2390_v24 = vpop.permute.xlu0 %2389  ;;  %v2396_v25 = vpop.permute.xlu1 %2395 }
 0x52c   :  { %v2412_v33 = vsel %vm2411_vm5, %v2409_v30, %v2396_v25  ;;  %v2410_v36 = vsel %vm1680_vm4, %v2378_v32, %v2390_v24 }
 0x52f   :  { %v2398_v31 = vpop.permute.xlu1 %2397 }
 0x530   :  { %v2404_v34 = vpop.permute.xlu0 %2403  ;;  %v2413_v37 = vsel %vm2411_vm5, %v2410_v36, %v2398_v31 }
 0x531   :  { %v2415_v35 = vsel %vm2414_vm6, %v2412_v33, %v2404_v34 }
 0x532   :  { %2774 = vmatprep.mubr.msk.f32.mxu0 %vm68_vm0, %v2415_v35 }
 0x533   :  { %v2406_v38 = vpop.permute.xlu1 %2405 }
 0x534   :  { %v2416_v39 = vsel %vm2414_vm6, %v2413_v37, %v2406_v38 }
 0x535   :  { %2775 = vmatmul.mubr.msk.f32.vlgmr.msra.gmra.mxu0 %vm68_vm0, %v2416_v39 }
 0x5f5   :  { %v2776_v41 = vpop.f32.mrf.mxu0 }
 0x5f6   :  { %v2506_v27 = vadd.f32 %v2776_v41, %v2572_v40 }
 0x5f7   :  { %v2500_v42 = vpop.f32.mrf.mxu0 }
 0x5f8   :  { %2510 = vst.msk [vmem:[#allocation7 + $0x8] sm:$0xff] %vm68_vm0, %v2506_v27  ;;  %v2501_v11 = vadd.f32 %v2572_v40, %v2500_v42 }
 0x5fa   :  { %2509 = vst.msk [vmem:[#allocation7] sm:$0xff] %vm68_vm0, %v2501_v11 }
 0x5fb   :  { %2878 = shalt.err (!%p2875_p0)
}
 0x5fc   :  { %2522 = dma.vmem_to_hbm [thread:$0]  %s2517_s10, 256, %s3381_s7, [#allocation4], %s2894_s27, %s2894_s27, %s2895_s28  }
 0x5fd   :  { %2891 = dma.done.wait [#allocation4], 256  }
 0x5fe   :  { %2892 = vsyncadd [#allocation4], 4294967040 }
 0x5ff   :  { %2526 = vsyncpa [#allocation3], 1 }
 0x600   :  { %2527 = vsyncpa [#allocation6], 1 }
 0x601   :  { %2528 = vsyncpa [#allocation4], 1 }

</bundles_post_ra>
